<compile_context>
chip_gen: v7x
topology: tpu7x:2x2x1
jax: 0.10.0
libtpu: 0.0.40
codegen_flags: <defaults>
</compile_context>

<pallas_src>
import functools

import jax
import jax.numpy as jnp
from jax.experimental import pallas as pl
from jax.experimental.pallas import tpu as pltpu


# ----------------------------------------------------------------------------
# Kernel
# ----------------------------------------------------------------------------
def _mlp_actor_kernel(act_limit, valid_rows, tb, x_ref,
                      w1_ref, b1_ref,
                      w2_ref, b2_ref,
                      w3_ref, b3_ref,
                      o_ref):
    # x_ref: (TB, obs_dim) in the caller's obs dtype; weights in matmul dtype
    # (bf16 by default). Biases f32; accumulation + epilogue in f32.
    x = x_ref[...]

    # Zero the out-of-range tail rows of a ragged last tile (static no-op when
    # the batch divides the tile evenly). Keeps garbage out of the matmuls.
    if valid_rows is not None:
        row = pl.program_id(0) * tb + jax.lax.broadcasted_iota(
            jnp.int32, x.shape, 0)
        x = jnp.where(row < valid_rows, x, 0)

    # Per-tile cast to the matmul dtype (VPU, hidden under the DMA stream).
    x = x.astype(w1_ref.dtype)

    # Layer 1: Linear + ReLU  (f32 accumulate)
    h1 = jnp.dot(x, w1_ref[...], preferred_element_type=jnp.float32)
    h1 = jnp.maximum(h1 + b1_ref[...], 0.0)

    # Layer 2: Linear + ReLU
    h2 = jnp.dot(h1.astype(w2_ref.dtype), w2_ref[...],
                 preferred_element_type=jnp.float32)
    h2 = jnp.maximum(h2 + b2_ref[...], 0.0)

    # Output layer: narrow (TB, act_dim) result -> Tanh -> scale.
    z = jnp.dot(h2.astype(w3_ref.dtype), w3_ref[...],
                preferred_element_type=jnp.float32) + b3_ref[...]
    o_ref[...] = (act_limit * jnp.tanh(z)).astype(o_ref.dtype)


# ----------------------------------------------------------------------------
# Param preparation (one-time, hoisted out of the per-call path)
# ----------------------------------------------------------------------------
def _round_up(x, m):
    return ((x + m - 1) // m) * m


def prepare_params(params, matmul_dtype=jnp.bfloat16):
    """Zero-pad hidden feature dims to multiples of 128 (exact: padded rows /
    columns / bias entries are zero) and cast weights to the MXU streaming
    dtype. The output (act) dim is intentionally NOT padded: the kernel writes
    a narrow (TB, act_dim) block so HBM writeback stays tiny. Call once."""
    h1 = params["w1"].shape[1]
    h2 = params["w2"].shape[1]
    h1p, h2p = _round_up(h1, 128), _round_up(h2, 128)

    def pad2(x, rows, cols):
        return jnp.pad(x, ((0, rows - x.shape[0]), (0, cols - x.shape[1])))

    return {
        "w1": pad2(params["w1"], params["w1"].shape[0], h1p).astype(matmul_dtype),
        "b1": pad2(params["b1"], 1, h1p).astype(jnp.float32),
        "w2": pad2(params["w2"], h1p, h2p).astype(matmul_dtype),
        "b2": pad2(params["b2"], 1, h2p).astype(jnp.float32),
        "w3": pad2(params["w3"], h2p, params["w3"].shape[1]).astype(matmul_dtype),
        "b3": params["b3"].astype(jnp.float32),
    }


def _vmem_limit_bytes(TB, obs_dim, H1, H2, act_dim, obs_isz, w_isz):
    """Rough VMEM budget: double-buffered obs/out blocks + resident weights +
    f32 intermediates. Clamped to [32 MiB, 48 MiB] so it is valid on
    v5e/v6e (128 MiB physical) and v7x (64 MiB physical)."""
    lane = 128
    obs_c = _round_up(obs_dim, lane)
    out_c = _round_up(act_dim, lane)
    est = (2 * TB * obs_c * obs_isz                       # obs double buffer
           + 2 * TB * out_c * 4                           # out double buffer
           + 2 * ((obs_c * H1 + H1 * H2 + H2 * out_c) * w_isz
                  + (H1 + H2 + out_c) * 4)                # resident weights/bias
           + 6 * TB * max(H1, H2, lane) * 4)              # f32 intermediates
    return int(min(max(est, 32 * 1024 * 1024), 48 * 1024 * 1024))


# ----------------------------------------------------------------------------
# Forward
# ----------------------------------------------------------------------------
@functools.partial(jax.jit, static_argnames=("act_limit", "batch_tile"))
def mlp_actor_forward(obs, params, act_limit, batch_tile=2048):
    """obs: (B, obs_dim). params: output of prepare_params(). Returns (B, act_dim) f32."""
    B, obs_dim = obs.shape
    H1 = params["w1"].shape[1]
    H2 = params["w2"].shape[1]
    act_dim = params["w3"].shape[1]

    # Batch tile: sublane-aligned, capped by batch_tile; once the batch is big
    # enough keep >=4 grid steps so v7x's two TensorCores both get work.
    TB = min(batch_tile, _round_up(B, 8))
    if B >= 32:
        TB = min(TB, _round_up(-(-B // 4), 8))
    TB = max(TB, 8)

    grid = (pl.cdiv(B, TB),)
    ragged = (B % TB) != 0

    kernel = functools.partial(_mlp_actor_kernel, float(act_limit),
                               B if ragged else None, TB)

    vmem_limit = _vmem_limit_bytes(TB, obs_dim, H1, H2, act_dim,
                                   obs.dtype.itemsize,
                                   params["w1"].dtype.itemsize)

    # TODO(synk): downstream consumers tolerating bf16 actions could switch the
    # out_shape dtype to bf16 to halve the (already tiny) writeback further.
    return pl.pallas_call(
        kernel,
        out_shape=jax.ShapeDtypeStruct((B, act_dim), jnp.float32),
        grid=grid,
        in_specs=[
            pl.BlockSpec((TB, obs_dim), lambda i: (i, 0)),   # streamed obs tile
            pl.BlockSpec((obs_dim, H1), lambda i: (0, 0)),   # resident weights
            pl.BlockSpec((1, H1),       lambda i: (0, 0)),
            pl.BlockSpec((H1, H2),      lambda i: (0, 0)),
            pl.BlockSpec((1, H2),       lambda i: (0, 0)),
            pl.BlockSpec((H2, act_dim), lambda i: (0, 0)),
            pl.BlockSpec((1, act_dim),  lambda i: (0, 0)),
        ],
        out_specs=pl.BlockSpec((TB, act_dim), lambda i: (i, 0)),
        compiler_params=pltpu.CompilerParams(
            dimension_semantics=("parallel",),               # megacore on v7x
            vmem_limit_bytes=vmem_limit),
    )(obs, params["w1"], params["b1"], params["w2"], params["b2"],
      params["w3"], params["b3"])


# ----------------------------------------------------------------------------
# Reference / init
# ----------------------------------------------------------------------------
def init_params(key, obs_dim, hidden_sizes, act_dim):
    """Deterministic synthetic init (PyTorch-Linear-style uniform fan-in)."""
    sizes = [obs_dim] + list(hidden_sizes) + [act_dim]
    params = {}
    for j in range(len(sizes) - 1):
        key, kw, kb = jax.random.split(key, 3)
        bound = 1.0 / jnp.sqrt(sizes[j])
        params[f"w{j+1}"] = jax.random.uniform(
            kw, (sizes[j], sizes[j + 1]), jnp.float32, -bound, bound)
        params[f"b{j+1}"] = jax.random.uniform(
            kb, (1, sizes[j + 1]), jnp.float32, -bound, bound)
    return params


def reference_forward(obs, params, act_limit):
    h = jnp.maximum(obs @ params["w1"] + params["b1"], 0.0)
    h = jnp.maximum(h @ params["w2"] + params["b2"], 0.0)
    return act_limit * jnp.tanh(h @ params["w3"] + params["b3"])


# ----------------------------------------------------------------------------
# Test
# ----------------------------------------------------------------------------
if __name__ == "__main__":
    obs_dim, act_dim = 16, 4
    hidden_sizes = (32, 32)
    act_limit = 2.0

    key = jax.random.PRNGKey(0)
    key, kobs = jax.random.split(key)
    params = init_params(key, obs_dim, hidden_sizes, act_dim)

    # 1) Small batch, f32 weights (tight check vs reference).
    prep_f32 = prepare_params(params, matmul_dtype=jnp.float32)
    obs = jax.random.normal(kobs, (8, obs_dim), jnp.float32)
    out = jax.block_until_ready(mlp_actor_forward(obs, prep_f32, act_limit))
    ref = reference_forward(obs, params, act_limit)
    assert out.shape == (8, act_dim)
    assert jnp.allclose(out, ref, atol=1e-5, rtol=1e-5), "f32 mismatch vs reference"

    # 2) Larger batch, small batch_tile -> multi-step grid with a ragged last
    #    tile (52 % 16 != 0) exercising OOB-write discard + in-kernel masking.
    key, kobs2 = jax.random.split(key)
    obs2 = jax.random.normal(kobs2, (52, obs_dim), jnp.float32)
    out2 = jax.block_until_ready(
        mlp_actor_forward(obs2, prep_f32, act_limit, batch_tile=16))
    ref2 = reference_forward(obs2, params, act_limit)
    assert out2.shape == (52, act_dim)
    assert jnp.allclose(out2, ref2, atol=1e-5, rtol=1e-5), "tiled f32 mismatch"

    # 3) Default bf16 streaming path (f32 accumulation); loose sanity check.
    prep_bf16 = prepare_params(params)  # bf16 default
    out3 = jax.block_until_ready(
        mlp_actor_forward(obs2, prep_bf16, act_limit, batch_tile=16))
    assert out3.shape == (52, act_dim)
    assert jnp.allclose(out3, ref2, atol=1e-1, rtol=1e-1), "bf16 sanity mismatch"

    print("KERNEL_OK")
</pallas_src>

<mosaic_0001>
module attributes {stable_mosaic.version = 11 : i64} {
  func.func @_mlp_actor_kernel(%arg0: i32, %arg1: memref<8x16xf32, #tpu.memory_space<vmem>>, %arg2: memref<16x128xf32, #tpu.memory_space<vmem>>, %arg3: memref<1x128xf32, #tpu.memory_space<vmem>>, %arg4: memref<128x128xf32, #tpu.memory_space<vmem>>, %arg5: memref<1x128xf32, #tpu.memory_space<vmem>>, %arg6: memref<128x4xf32, #tpu.memory_space<vmem>>, %arg7: memref<1x4xf32, #tpu.memory_space<vmem>>, %arg8: memref<8x4xf32, #tpu.memory_space<vmem>>) attributes {dimension_semantics = [#tpu.dimension_semantics<parallel>], iteration_bounds = array<i64: 1>, scalar_prefetch = 0 : i64, scratch_operands = 0 : i64, tpu.core_type = #tpu.core_type<tc>, window_params = [{transform_indices = @transform_0, window_bounds = array<i64: 8, 16>}, {pipeline_mode = #tpu.pipeline_mode<synchronous>, transform_indices = @transform_1, window_bounds = array<i64: 16, 128>}, {pipeline_mode = #tpu.pipeline_mode<synchronous>, transform_indices = @transform_2, window_bounds = array<i64: 1, 128>}, {pipeline_mode = #tpu.pipeline_mode<synchronous>, transform_indices = @transform_3, window_bounds = array<i64: 128, 128>}, {pipeline_mode = #tpu.pipeline_mode<synchronous>, transform_indices = @transform_4, window_bounds = array<i64: 1, 128>}, {pipeline_mode = #tpu.pipeline_mode<synchronous>, transform_indices = @transform_5, window_bounds = array<i64: 128, 4>}, {pipeline_mode = #tpu.pipeline_mode<synchronous>, transform_indices = @transform_6, window_bounds = array<i64: 1, 4>}, {transform_indices = @transform_7, window_bounds = array<i64: 8, 4>}]} {
    %c0 = arith.constant 0 : index
    %c0_0 = arith.constant 0 : index
    %0 = vector.load %arg1[%c0, %c0_0] : memref<8x16xf32, #tpu.memory_space<vmem>>, vector<8x16xf32>
    %c0_1 = arith.constant 0 : index
    %c0_2 = arith.constant 0 : index
    %1 = vector.load %arg2[%c0_1, %c0_2] : memref<16x128xf32, #tpu.memory_space<vmem>>, vector<16x128xf32>
    %cst = arith.constant dense<0.000000e+00> : vector<8x128xf32>
    %2 = tpu.matmul %0, %1, %cst {dimension_numbers = #tpu.dot_dimension_numbers<[1], [0], [0], [1], [0, 0, 1, 1], [], []>} : vector<8x16xf32>, vector<16x128xf32>, vector<8x128xf32> -> vector<8x128xf32>
    %c0_3 = arith.constant 0 : index
    %c0_4 = arith.constant 0 : index
    %3 = vector.load %arg3[%c0_3, %c0_4] : memref<1x128xf32, #tpu.memory_space<vmem>>, vector<1x128xf32>
    %4 = vector.broadcast %3 : vector<1x128xf32> to vector<8x128xf32>
    %5 = arith.addf %2, %4 : vector<8x128xf32>
    %cst_5 = arith.constant 0.000000e+00 : f32
    %6 = vector.broadcast %cst_5 : f32 to vector<8x128xf32>
    %7 = arith.maximumf %5, %6 : vector<8x128xf32>
    %c0_6 = arith.constant 0 : index
    %c0_7 = arith.constant 0 : index
    %8 = vector.load %arg4[%c0_6, %c0_7] : memref<128x128xf32, #tpu.memory_space<vmem>>, vector<128x128xf32>
    %cst_8 = arith.constant dense<0.000000e+00> : vector<8x128xf32>
    %9 = tpu.matmul %7, %8, %cst_8 {dimension_numbers = #tpu.dot_dimension_numbers<[1], [0], [0], [1], [0, 0, 1, 1], [], []>} : vector<8x128xf32>, vector<128x128xf32>, vector<8x128xf32> -> vector<8x128xf32>
    %c0_9 = arith.constant 0 : index
    %c0_10 = arith.constant 0 : index
    %10 = vector.load %arg5[%c0_9, %c0_10] : memref<1x128xf32, #tpu.memory_space<vmem>>, vector<1x128xf32>
    %11 = vector.broadcast %10 : vector<1x128xf32> to vector<8x128xf32>
    %12 = arith.addf %9, %11 : vector<8x128xf32>
    %cst_11 = arith.constant 0.000000e+00 : f32
    %13 = vector.broadcast %cst_11 : f32 to vector<8x128xf32>
    %14 = arith.maximumf %12, %13 : vector<8x128xf32>
    %c0_12 = arith.constant 0 : index
    %c0_13 = arith.constant 0 : index
    %15 = vector.load %arg6[%c0_12, %c0_13] : memref<128x4xf32, #tpu.memory_space<vmem>>, vector<128x4xf32>
    %cst_14 = arith.constant dense<0.000000e+00> : vector<8x4xf32>
    %16 = tpu.matmul %14, %15, %cst_14 {dimension_numbers = #tpu.dot_dimension_numbers<[1], [0], [0], [1], [0, 0, 1, 1], [], []>} : vector<8x128xf32>, vector<128x4xf32>, vector<8x4xf32> -> vector<8x4xf32>
    %c0_15 = arith.constant 0 : index
    %c0_16 = arith.constant 0 : index
    %17 = vector.load %arg7[%c0_15, %c0_16] : memref<1x4xf32, #tpu.memory_space<vmem>>, vector<1x4xf32>
    %18 = vector.broadcast %17 : vector<1x4xf32> to vector<8x4xf32>
    %19 = arith.addf %16, %18 : vector<8x4xf32>
    %20 = math.tanh %19 : vector<8x4xf32>
    %cst_17 = arith.constant 2.000000e+00 : f32
    %21 = vector.broadcast %cst_17 : f32 to vector<8x4xf32>
    %22 = arith.mulf %21, %20 : vector<8x4xf32>
    %c0_18 = arith.constant 0 : index
    %c0_19 = arith.constant 0 : index
    %23 = vector.load %arg8[%c0_18, %c0_19] : memref<8x4xf32, #tpu.memory_space<vmem>>, vector<8x4xf32>
    tpu.vector_store %arg8[%c0_18, %c0_19], %22 {strides = array<i32>} : memref<8x4xf32, #tpu.memory_space<vmem>>, vector<8x4xf32>,
    return
  }
  func.func @transform_0(%arg0: i32) -> (i32, i32) {
    %c0_i32 = arith.constant 0 : i32
    %c0_i32_0 = arith.constant 0 : i32
    return %arg0, %c0_i32 : i32, i32
  }
  func.func @transform_1(%arg0: i32) -> (i32, i32) {
    %c0_i32 = arith.constant 0 : i32
    %c0_i32_0 = arith.constant 0 : i32
    %c0_i32_1 = arith.constant 0 : i32
    return %c0_i32, %c0_i32_0 : i32, i32
  }
  func.func @transform_2(%arg0: i32) -> (i32, i32) {
    %c0_i32 = arith.constant 0 : i32
    %c0_i32_0 = arith.constant 0 : i32
    %c0_i32_1 = arith.constant 0 : i32
    return %c0_i32, %c0_i32_0 : i32, i32
  }
  func.func @transform_3(%arg0: i32) -> (i32, i32) {
    %c0_i32 = arith.constant 0 : i32
    %c0_i32_0 = arith.constant 0 : i32
    %c0_i32_1 = arith.constant 0 : i32
    return %c0_i32, %c0_i32_0 : i32, i32
  }
  func.func @transform_4(%arg0: i32) -> (i32, i32) {
    %c0_i32 = arith.constant 0 : i32
    %c0_i32_0 = arith.constant 0 : i32
    %c0_i32_1 = arith.constant 0 : i32
    return %c0_i32, %c0_i32_0 : i32, i32
  }
  func.func @transform_5(%arg0: i32) -> (i32, i32) {
    %c0_i32 = arith.constant 0 : i32
    %c0_i32_0 = arith.constant 0 : i32
    %c0_i32_1 = arith.constant 0 : i32
    return %c0_i32, %c0_i32_0 : i32, i32
  }
  func.func @transform_6(%arg0: i32) -> (i32, i32) {
    %c0_i32 = arith.constant 0 : i32
    %c0_i32_0 = arith.constant 0 : i32
    %c0_i32_1 = arith.constant 0 : i32
    return %c0_i32, %c0_i32_0 : i32, i32
  }
  func.func @transform_7(%arg0: i32) -> (i32, i32) {
    %c0_i32 = arith.constant 0 : i32
    %c0_i32_0 = arith.constant 0 : i32
    return %arg0, %c0_i32 : i32, i32
  }
}

</mosaic_0001>

<bundles_post_ra>
// kernel: mlp_actor_forward.1
= control target key start
LH: loop header
LB: loop body
LE: loop exit
PB: predicated region body
PF: predicated region fallthrough
CT: control target
= control target key end

     0   :  { %12 = vsyncpa [#allocation3], 0  ;;  %s518_s24 = smov [#allocation2]   ;;  %s708_s0 = inlined_call_operand.hbm [shape: f32[8,16], index: 0, kind: input, shape index: {}]   ;;  %s709_s1 = inlined_call_operand.vmem [shape: f32[16,128], index: 1, kind: input, shape index: {}]   ;;  %s710_s2 = inlined_call_operand.vmem [shape: f32[1,128], index: 2, kind: input, shape index: {}]   ;;  %s711_s3 = inlined_call_operand.vmem [shape: f32[128,128], index: 3, kind: input, shape index: {}]   ;;  %s712_s4 = inlined_call_operand.vmem [shape: f32[1,128], index: 4, kind: input, shape index: {}]   ;;  %s713_s5 = inlined_call_operand.vmem [shape: f32[128,4], index: 5, kind: input, shape index: {}]   ;;  %s714_s6 = inlined_call_operand.vmem [shape: f32[1,4], index: 6, kind: input, shape index: {}]   ;;  %s715_s7 = inlined_call_operand.vmem [shape: f32[8,4], index: 7, kind: output, shape index: {}]  }
   0x1   :  { %s19_s25 = sshll.u32 %s518_s24, 4  ;;  %s494_s28 = scalar_lea.hbm %s708_s0, 128  ;;  %s20_s25 = int_to_ptr.vmem [resolvable:$true] %s19_s25 }
   0x2   :  { %p495_p0 = scmp.ne.s32.totalorder %s708_s0, %s494_s28  ;;  %p498_p1 = scmp.lt.u32.totalorder %s494_s28, %s708_s0 }
   0x4   :  { %p500_p2 = pnand %p498_p1, %p495_p0 }
   0x6   :  { %503 = shalt.err (!%p500_p2)
}
   0x7   :  { %s504_s10 = scalar_lea.vmem %s20_s25, 128  ;;  %p509_p4 = scmp.lt.s32.totalorder %s20_s25, %s20_s25 }
   0x8   :  { %p505_p3 = scmp.ne.s32.totalorder %s20_s25, %s504_s10  ;;  %p510_p5 = scmp.lt.s32.totalorder %s504_s10, %s504_s10 }
   0xa   :  { %p511_p6 = por %p510_p5, %p509_p4 }
   0xc   :  { %p512_p7 = pnand %p511_p6, %p505_p3 }
   0xe   :  { %515 = shalt.err (!%p512_p7)
}
   0xf   :  { %22 = dma.hbm_to_vmem [thread:$0]  %s708_s0, 128, %s20_s25, [#allocation3]  }
  0x10   :  { %516 = dma.done.wait [#allocation3], 128  }
  0x11   :  { %517 = vsyncadd [#allocation3], 4294967168  ;;  %v519_v0 = vmov 0.0|0.0   ;;  %vm520_vm0 = vmmov 0   ;;  %v521_v1 = vmov 0.0   ;;  %v39_v2 = vld [vmem:[%s709_s1] sm:$0xff] }
  0x12   :  { %437 = vmatprep.subr.bf16.mxu0 %v519_v0  ;;  %364 = vmatprep.mubr.msk.f32.mxu0 %vm520_vm0, %v521_v1  ;;  %v40_v3 = vld [vmem:[%s709_s1 + $0x8] sm:$0xff]  ;;  %v123_v5 = vld [vmem:[%s711_s3] sm:$0xff]  ;;  %v125_v7 = vld [vmem:[%s711_s3 + $0x10] sm:$0xff]  ;;  %vm48_vm1 = vcmask 130048   ;;  %vm312_vm2 = vcmask 31744  }
  0x13   :  { %440 = vmatprep.subr.bf16.mxu1 %v519_v0  ;;  %399 = vmatprep.mubr.msk.f32.mxu1 %vm520_vm0, %v521_v1  ;;  %v438_v4 = vpack.c.bf16 %v40_v3, %v39_v2  ;;  %v124_v6 = vld [vmem:[%s711_s3 + $0x8] sm:$0xff]  ;;  %v126_v9 = vld [vmem:[%s711_s3 + $0x18] sm:$0xff]  ;;  %v38_v10 = vld [vmem:[#allocation2] sm:$0xff] }
  0x14   :  { %v441_v8 = vpack.c.bf16 %v124_v6, %v123_v5  ;;  %v444_v11 = vpack.c.bf16 %v126_v9, %v125_v7  ;;  %v127_v12 = vld [vmem:[%s711_s3 + $0x20] sm:$0xff]  ;;  %v128_v13 = vld [vmem:[%s711_s3 + $0x28] sm:$0xff]  ;;  %v129_v15 = vld [vmem:[%s711_s3 + $0x30] sm:$0xff] }
  0x15   :  { %439 = vmatpush3.bf16.msra.mxu0 %v438_v4  ;;  %v447_v14 = vpack.c.bf16 %v128_v13, %v127_v12  ;;  %v130_v16 = vld [vmem:[%s711_s3 + $0x38] sm:$0xff]  ;;  %v131_v18 = vld [vmem:[%s711_s3 + $0x40] sm:$0xff]  ;;  %v132_v19 = vld [vmem:[%s711_s3 + $0x48] sm:$0xff] }
  0x16   :  { %442 = vmatpush3.bf16.msra.mxu1 %v441_v8  ;;  %464 = vmatprep.subr.bf16.mxu0 %v519_v0  ;;  %v450_v17 = vpack.c.bf16 %v130_v16, %v129_v15  ;;  %v453_v20 = vpack.c.bf16 %v132_v19, %v131_v18  ;;  %v133_v21 = vld [vmem:[%s711_s3 + $0x50] sm:$0xff]  ;;  %v134_v22 = vld [vmem:[%s711_s3 + $0x58] sm:$0xff]  ;;  %v135_v24 = vld [vmem:[%s711_s3 + $0x60] sm:$0xff] }
  0x17   :  { %443 = vmatprep.subr.bf16.mxu1 %v519_v0  ;;  %v456_v23 = vpack.c.bf16 %v134_v22, %v133_v21  ;;  %v136_v25 = vld [vmem:[%s711_s3 + $0x68] sm:$0xff]  ;;  %v137_v27 = vld [vmem:[%s711_s3 + $0x70] sm:$0xff]  ;;  %v138_v28 = vld [vmem:[%s711_s3 + $0x78] sm:$0xff] }
  0x18   :  { %365 = vmatmul.mubr.msk.f32.vlgmr.msra.gmra.mrb[0].mxu0 %vm48_vm1, %v38_v10  ;;  %v459_v26 = vpack.c.bf16 %v136_v25, %v135_v24  ;;  %v462_v29 = vpack.c.bf16 %v138_v28, %v137_v27  ;;  %v217_v30 = vld [vmem:[%s713_s5] sm:$0xff]  ;;  %v218_v31 = vld [vmem:[%s713_s5 + $0x8] sm:$0xff]  ;;  %v219_v32 = vld [vmem:[%s713_s5 + $0x10] sm:$0xff] }
  0x19   :  { %434 = vmatprep.mubr.msk.f32.mxu0 %vm520_vm0, %v521_v1  ;;  %v465_v33 = vpack.c.bf16 %v218_v31, %v217_v30  ;;  %v220_v34 = vld [vmem:[%s713_s5 + $0x18] sm:$0xff]  ;;  %v221_v36 = vld [vmem:[%s713_s5 + $0x20] sm:$0xff]  ;;  %v222_v37 = vld [vmem:[%s713_s5 + $0x28] sm:$0xff] }
  0x1a   :  { %445 = vmatpush3.bf16.msra.mxu1 %v444_v11  ;;  %v468_v35 = vpack.c.bf16 %v220_v34, %v219_v32  ;;  %v471_v38 = vpack.c.bf16 %v222_v37, %v221_v36  ;;  %v223_v39 = vld [vmem:[%s713_s5 + $0x30] sm:$0xff]  ;;  %v224_v40 = vld [vmem:[%s713_s5 + $0x38] sm:$0xff]  ;;  %v225_v42 = vld [vmem:[%s713_s5 + $0x40] sm:$0xff] }
  0x1b   :  { %446 = vmatprep.subr.bf16.mxu1 %v519_v0  ;;  %466 = vmatpush3.bf16.msra.mxu0 %v465_v33  ;;  %v474_v41 = vpack.c.bf16 %v224_v40, %v223_v39  ;;  %v226_v43 = vld [vmem:[%s713_s5 + $0x48] sm:$0xff]  ;;  %v227_v45 = vld [vmem:[%s713_s5 + $0x50] sm:$0xff]  ;;  %v228_v46 = vld [vmem:[%s713_s5 + $0x58] sm:$0xff] }
  0x1c   :  { %467 = vmatprep.subr.bf16.mxu0 %v519_v0  ;;  %v477_v44 = vpack.c.bf16 %v226_v43, %v225_v42  ;;  %v480_v47 = vpack.c.bf16 %v228_v46, %v227_v45  ;;  %v229_v48 = vld [vmem:[%s713_s5 + $0x60] sm:$0xff]  ;;  %v230_v49 = vld [vmem:[%s713_s5 + $0x68] sm:$0xff]  ;;  %v231_v56 = vld [vmem:[%s713_s5 + $0x70] sm:$0xff] }
  0x1d   :  { %v483_v50 = vpack.c.bf16 %v230_v49, %v229_v48  ;;  %v319_v51 = vld [vmem:[%s710_s2] ss:$0 sm:$0xff]  ;;  %v232_v57 = vld [vmem:[%s713_s5 + $0x78] sm:$0xff] }
  0x1e   :  { %448 = vmatpush3.bf16.msra.mxu1 %v447_v14  ;;  %v486_v58 = vpack.c.bf16 %v232_v57, %v231_v56  ;;  %v321_v59 = vld [vmem:[%s712_s4] ss:$0 sm:$0xff] }
  0x1f   :  { %449 = vmatprep.subr.bf16.mxu1 %v519_v0  ;;  %469 = vmatpush3.bf16.msra.mxu0 %v468_v35 }
  0x20   :  { %470 = vmatprep.subr.bf16.mxu0 %v519_v0 }
  0x22   :  { %451 = vmatpush3.bf16.msra.mxu1 %v450_v17 }
  0x23   :  { %452 = vmatprep.subr.bf16.mxu1 %v519_v0  ;;  %472 = vmatpush3.bf16.msra.mxu0 %v471_v38 }
  0x24   :  { %473 = vmatprep.subr.bf16.mxu0 %v519_v0 }
  0x26   :  { %454 = vmatpush3.bf16.msra.mxu1 %v453_v20 }
  0x27   :  { %455 = vmatprep.subr.bf16.mxu1 %v519_v0  ;;  %475 = vmatpush3.bf16.msra.mxu0 %v474_v41 }
  0x28   :  { %476 = vmatprep.subr.bf16.mxu0 %v519_v0 }
  0x2a   :  { %457 = vmatpush3.bf16.msra.mxu1 %v456_v23 }
  0x2b   :  { %458 = vmatprep.subr.bf16.mxu1 %v519_v0  ;;  %478 = vmatpush3.bf16.msra.mxu0 %v477_v44 }
  0x2c   :  { %479 = vmatprep.subr.bf16.mxu0 %v519_v0 }
  0x2e   :  { %460 = vmatpush3.bf16.msra.mxu1 %v459_v26 }
  0x2f   :  { %461 = vmatprep.subr.bf16.mxu1 %v519_v0  ;;  %481 = vmatpush3.bf16.msra.mxu0 %v480_v47 }
  0x30   :  { %482 = vmatprep.subr.bf16.mxu0 %v519_v0 }
  0x32   :  { %463 = vmatpush3.bf16.msra.mxu1 %v462_v29 }
  0x33   :  { %484 = vmatpush3.bf16.msra.mxu0 %v483_v50 }
  0x34   :  { %485 = vmatprep.subr.bf16.mxu0 %v519_v0  ;;  %v322_v0 = vld [vmem:[%s714_s6] ss:$0 sm:$0xff] }
  0x37   :  { %487 = vmatpush3.bf16.msra.mxu0 %v486_v58 }
  0xeb   :  { %v118_v52 = vpop.f32.mrb[0].mxu0 }
  0xec   :  { %v119_v53 = vadd.f32 %v319_v51, %v118_v52  ;;  %v366_v54 = vpop.f32.mrb[1].mxu0 }
  0xee   :  { %v122_v55 = vmax.f32 %v119_v53, 0.0 }
  0xf0   :  { %400 = vmatmul.mubr.f32.vlgmr.msra.gmra.mrb[0].mxu1 %v122_v55 }
 0x1c3   :  { %v212_v60 = vpop.f32.mrb[0].mxu1 }
 0x1c4   :  { %v213_v61 = vadd.f32 %v321_v59, %v212_v60  ;;  %v401_v62 = vpop.f32.mrb[1].mxu1 }
 0x1c6   :  { %v216_v63 = vmax.f32 %v213_v61, 0.0 }
 0x1c8   :  { %435 = vmatmul.mubr.f32.vlgmr.msra.gmra.mrb[2].mxu0 %v216_v63 }
 0x29b   :  { %v306_v1 = vpop.f32.mrb[2].mxu0 }
 0x29c   :  { %v307_v2 = vadd.f32 %v322_v0, %v306_v1  ;;  %v436_v3 = vpop.f32.mrb[3].mxu0 }
 0x29e   :  { %492 = vtanh.f32 %v307_v2 }
 0x2a8   :  { %v493_v4 = vpop.eup %492 }
 0x2a9   :  { %v311_v5 = vmul.f32 2.0, %v493_v4 }
 0x2ab   :  { %313 = vst.msk [vmem:[%s715_s7] sm:$0xff] %vm312_vm2, %v311_v5 }
 0x2ac   :  { %318 = vsyncpa [#allocation3], 1 }

</bundles_post_ra>
